<compile_context>
chip_gen: v7x
topology: tpu7x:2x2x1
jax: 0.10.0
libtpu: 0.0.40
codegen_flags: <defaults>
</compile_context>

<pallas_src>
import functools

import jax
import jax.numpy as jnp
from jax.experimental import pallas as pl
from jax.experimental.pallas import tpu as pltpu

_LANE = 128
_BLOCK_BYTES = 2 * 1024 * 1024   # per-input HBM block (~2 MiB, dtype-agnostic)
_CHUNK_ROWS = 64                 # sub-slab rows kept vreg-resident


def _round_up(x, m):
    return ((x + m - 1) // m) * m


def _num_tensorcores() -> int:
    """Best-effort TensorCore-per-chip count (v7x has 2); fallback 2 is
    harmless on single-TC chips (serial second pass)."""
    try:
        info = pltpu.get_tpu_info()
        for name in ("num_cores", "core_count", "num_tensorcores",
                     "tensorcore_count", "tensorcores_per_chip",
                     "cores_per_chip"):
            v = getattr(info, name, None)
            if v is not None:
                v = int(v)
                if 1 <= v <= 16:
                    return v
    except Exception:
        pass
    return 2


def _cpg_partial_kernel(p_ref, t_ref, out_ref, sse_acc, sae_acc, *,
                        tm, chunk, inner, m_rows, mse_weight, l1_weight):
    c = pl.program_id(0)  # core-split axis (parallel)
    i = pl.program_id(1)  # streaming / reduction axis (arbitrary)

    @pl.when(i == 0)
    def _init():
        sse_acc[...] = jnp.zeros_like(sse_acc)
        sae_acc[...] = jnp.zeros_like(sae_acc)

    # Unclamped row offset of this block (the BlockSpec index_map clamps the
    # actual read; rows past m_rows are zeroed on the masked path).
    row_start = (c * inner + i) * tm
    n_chunks = tm // chunk

    def _fold(masked):
        # Stream the (tm,128) block in (chunk,128) sub-slabs; all
        # intermediates stay in vregs, accumulators carried through the loop.
        def body(j, carry):
            sse, sae = carry
            r0 = pl.multiple_of(j * chunk, chunk)
            p = p_ref[pl.ds(r0, chunk), :].astype(jnp.float32)
            t = t_ref[pl.ds(r0, chunk), :].astype(jnp.float32)
            d = p - t
            if masked:
                rid = (row_start + r0 +
                       jax.lax.broadcasted_iota(jnp.int32, (chunk, _LANE), 0))
                d = jnp.where(rid < m_rows, d, 0.0)
            sse = sse + (d * d).reshape(-1, 8, _LANE).sum(axis=0)
            sae = sae + jnp.abs(d).reshape(-1, 8, _LANE).sum(axis=0)
            return sse, sae

        zero = jnp.zeros((8, _LANE), jnp.float32)
        sse, sae = jax.lax.fori_loop(0, n_chunks, body, (zero, zero),
                                     unroll=min(8, n_chunks))
        sse_acc[...] += sse   # one VMEM read-modify-write per block
        sae_acc[...] += sae

    # Fast (unmasked) path for interior blocks; masked path only for the edge
    # block / clamped duplicate block of each core.
    @pl.when(row_start + tm <= m_rows)
    def _fast():
        _fold(masked=False)

    @pl.when(row_start + tm > m_rows)
    def _edge():
        _fold(masked=True)

    @pl.when(i == inner - 1)
    def _finalize():
        out_ref[0] = (jnp.float32(mse_weight) * sse_acc[...]
                      + jnp.float32(l1_weight) * sae_acc[...])


def _cpg_weighted_sums(p2, t2, mse_weight, l1_weight):
    """(splits, 8, 128) f32 per-lane partial sums of w_mse*d^2 + w_l1*|d|
    over the (rows, 128) inputs (inputs stream in their native dtype)."""
    m_rows = p2.shape[0]
    itemsize = jnp.dtype(p2.dtype).itemsize
    sublane = max(8, 32 // max(1, itemsize))  # 8 f32 / 16 bf16 / 32 int8-fp8

    # Byte-budgeted block height (rows); always a multiple of 64 for large
    # inputs, clipped to the (sublane-rounded) row count for small ones.
    budget_rows = max(sublane, _BLOCK_BYTES // (_LANE * itemsize))
    tm = min(budget_rows, _round_up(m_rows, sublane))

    # Sub-slab size for the in-kernel loop: largest power-of-two <= 64 rows
    # that divides tm (always >= the sublane pack).
    chunk = _CHUNK_ROWS
    while tm % chunk:
        chunk //= 2

    total_blocks = pl.cdiv(m_rows, tm)
    splits = max(1, min(_num_tensorcores(), total_blocks))
    inner = pl.cdiv(total_blocks, splits)

    def in_map(c, i):
        # Clamp so a core whose last step falls past the end re-reads an
        # in-bounds block; its contribution is masked to zero in the kernel.
        return (jnp.minimum(c * inner + i, total_blocks - 1), 0)

    kernel = functools.partial(
        _cpg_partial_kernel,
        tm=tm, chunk=chunk, inner=inner, m_rows=m_rows,
        mse_weight=float(mse_weight), l1_weight=float(l1_weight))

    return pl.pallas_call(
        kernel,
        out_shape=jax.ShapeDtypeStruct((splits, 8, _LANE), jnp.float32),
        grid_spec=pltpu.PrefetchScalarGridSpec(
            num_scalar_prefetch=0,
            grid=(splits, inner),
            in_specs=[
                pl.BlockSpec((tm, _LANE), in_map),
                pl.BlockSpec((tm, _LANE), in_map),
            ],
            out_specs=pl.BlockSpec((1, 8, _LANE), lambda c, i: (c, 0, 0)),
            scratch_shapes=[
                pltpu.VMEM((8, _LANE), jnp.float32),  # per-lane sum of d^2
                pltpu.VMEM((8, _LANE), jnp.float32),  # per-lane sum of |d|
            ]),
        compiler_params=pltpu.CompilerParams(
            dimension_semantics=("parallel", "arbitrary")),
    )(p2, t2)


def cpg_loss(pred, target, mse_weight=0.7, l1_weight=0.3):
    """mse_weight * mean((p-t)^2) + l1_weight * mean(|p-t|), matching
    torch F.mse_loss / F.l1_loss with default 'mean' reduction."""
    assert pred.shape == target.shape
    n = int(pred.size)
    assert n > 0

    p = pred.reshape(-1)
    t = target.reshape(-1)

    n_main = (n // _LANE) * _LANE  # lane-aligned prefix handled by the kernel
    tail = n - n_main

    total = jnp.zeros((), jnp.float32)
    if n_main:
        if tail:
            p_main, t_main = p[:n_main], t[:n_main]
        else:
            p_main, t_main = p, t  # no copy: pure reshape below
        partials = _cpg_weighted_sums(
            p_main.reshape(n_main // _LANE, _LANE),
            t_main.reshape(n_main // _LANE, _LANE),
            mse_weight, l1_weight)
        # Tiny (splits,8,128) cross-lane reduce left to XLA.
        total = total + jnp.sum(partials, dtype=jnp.float32)
    if tail:
        # < 128 leftover elements: tiny plain-JAX epilogue (avoids jnp.pad).
        dt = p[n_main:].astype(jnp.float32) - t[n_main:].astype(jnp.float32)
        total = total + (jnp.float32(mse_weight) * jnp.sum(dt * dt)
                         + jnp.float32(l1_weight) * jnp.sum(jnp.abs(dt)))

    return total / jnp.float32(n)


if __name__ == "__main__":
    key = jax.random.PRNGKey(0)
    k1, k2 = jax.random.split(key)
    # Small shapes consistent with a regression output, e.g. (batch=2, ch=4, 16, 16)
    pred = jax.random.normal(k1, (2, 4, 16, 16), dtype=jnp.float32)
    target = jax.random.normal(k2, (2, 4, 16, 16), dtype=jnp.float32)

    loss = cpg_loss(pred, target)
    jax.block_until_ready(loss)

    # reference check (plain JAX)
    mse_ref = jnp.mean((pred - target) ** 2)
    l1_ref = jnp.mean(jnp.abs(pred - target))
    ref = 0.7 * mse_ref + 0.3 * l1_ref
    assert jnp.allclose(loss, ref, rtol=1e-5, atol=1e-5), (loss, ref)

    print("KERNEL_OK")
</pallas_src>

<mosaic_0001>
module attributes {stable_mosaic.version = 11 : i64} {
  func.func @_cpg_partial_kernel(%arg0: i32, %arg1: i32, %arg2: memref<16x128xf32, #tpu.memory_space<vmem>>, %arg3: memref<16x128xf32, #tpu.memory_space<vmem>>, %arg4: memref<1x8x128xf32, #tpu.memory_space<vmem>>, %arg5: memref<8x128xf32, #tpu.memory_space<vmem>>, %arg6: memref<8x128xf32, #tpu.memory_space<vmem>>) attributes {dimension_semantics = [#tpu.dimension_semantics<parallel>, #tpu.dimension_semantics<arbitrary>], iteration_bounds = array<i64: 1, 1>, scalar_prefetch = 0 : i64, scratch_operands = 2 : i64, tpu.core_type = #tpu.core_type<tc>, window_params = [{transform_indices = @transform_0, window_bounds = array<i64: 16, 128>}, {transform_indices = @transform_1, window_bounds = array<i64: 16, 128>}, {transform_indices = @transform_2, window_bounds = array<i64: 1, 8, 128>}]} {
    %c0_i32 = arith.constant 0 : i32
    %0 = arith.cmpi eq, %arg1, %c0_i32 : i32
    %1 = arith.extui %0 : i1 to i32
    %c0_i32_0 = arith.constant 0 : i32
    %2 = arith.cmpi ne, %1, %c0_i32_0 : i32
    scf.if %2 {
      %cst = arith.constant 0.000000e+00 : f32
      %17 = vector.broadcast %cst : f32 to vector<8x128xf32>
      %c0 = arith.constant 0 : index
      %c0_9 = arith.constant 0 : index
      %18 = vector.load %arg5[%c0, %c0_9] : memref<8x128xf32, #tpu.memory_space<vmem>>, vector<8x128xf32>
      tpu.vector_store %arg5[%c0, %c0_9], %17 {strides = array<i32>} : memref<8x128xf32, #tpu.memory_space<vmem>>, vector<8x128xf32>,
      %cst_10 = arith.constant 0.000000e+00 : f32
      %19 = vector.broadcast %cst_10 : f32 to vector<8x128xf32>
      %c0_11 = arith.constant 0 : index
      %c0_12 = arith.constant 0 : index
      %20 = vector.load %arg6[%c0_11, %c0_12] : memref<8x128xf32, #tpu.memory_space<vmem>>, vector<8x128xf32>
      tpu.vector_store %arg6[%c0_11, %c0_12], %19 {strides = array<i32>} : memref<8x128xf32, #tpu.memory_space<vmem>>, vector<8x128xf32>,
    } else {
    }
    %c1_i32 = arith.constant 1 : i32
    %3 = arith.muli %arg0, %c1_i32 : i32
    %4 = arith.addi %3, %arg1 : i32
    %c16_i32 = arith.constant 16 : i32
    %5 = arith.muli %4, %c16_i32 : i32
    %c16_i32_1 = arith.constant 16 : i32
    %6 = arith.addi %5, %c16_i32_1 : i32
    %c16_i32_2 = arith.constant 16 : i32
    %7 = arith.cmpi sle, %6, %c16_i32_2 : i32
    %8 = arith.extui %7 : i1 to i32
    %c0_i32_3 = arith.constant 0 : i32
    %9 = arith.cmpi ne, %8, %c0_i32_3 : i32
    scf.if %9 {
      %cst = arith.constant 0.000000e+00 : f32
      %17 = vector.broadcast %cst : f32 to vector<8x128xf32>
      %c0_i32_9 = arith.constant 0 : i32
      %c16_i32_10 = arith.constant 16 : i32
      %18 = arith.muli %c0_i32_9, %c16_i32_10 : i32
      %19 = tpu.assume_multiple %18, 16 : i32
      %20 = arith.index_cast %19 : i32 to index
      %c0 = arith.constant 0 : index
      %21 = vector.load %arg2[%20, %c0] : memref<16x128xf32, #tpu.memory_space<vmem>>, vector<16x128xf32>
      %22 = arith.index_cast %19 : i32 to index
      %c0_11 = arith.constant 0 : index
      %23 = vector.load %arg3[%22, %c0_11] : memref<16x128xf32, #tpu.memory_space<vmem>>, vector<16x128xf32>
      %24 = arith.subf %21, %23 : vector<16x128xf32>
      %25 = arith.mulf %24, %24 : vector<16x128xf32>
      %26 = vector.shape_cast %25 : vector<16x128xf32> to vector<2x8x128xf32>
      %cst_12 = arith.constant dense<0.000000e+00> : vector<8x128xf32>
      %27 = vector.multi_reduction <add>, %26, %cst_12 [0] : vector<2x8x128xf32> to vector<8x128xf32>
      %28 = arith.addf %17, %27 : vector<8x128xf32>
      %29 = math.absf %24 : vector<16x128xf32>
      %30 = vector.shape_cast %29 : vector<16x128xf32> to vector<2x8x128xf32>
      %cst_13 = arith.constant dense<0.000000e+00> : vector<8x128xf32>
      %31 = vector.multi_reduction <add>, %30, %cst_13 [0] : vector<2x8x128xf32> to vector<8x128xf32>
      %32 = arith.addf %17, %31 : vector<8x128xf32>
      %c1_i32_14 = arith.constant 1 : i32
      %c0_15 = arith.constant 0 : index
      %c0_16 = arith.constant 0 : index
      %33 = vector.load %arg5[%c0_15, %c0_16] : memref<8x128xf32, #tpu.memory_space<vmem>>, vector<8x128xf32>
      %34 = arith.addf %33, %28 : vector<8x128xf32>
      %c0_17 = arith.constant 0 : index
      %c0_18 = arith.constant 0 : index
      %35 = vector.load %arg5[%c0_17, %c0_18] : memref<8x128xf32, #tpu.memory_space<vmem>>, vector<8x128xf32>
      tpu.vector_store %arg5[%c0_17, %c0_18], %34 {strides = array<i32>} : memref<8x128xf32, #tpu.memory_space<vmem>>, vector<8x128xf32>,
      %c0_19 = arith.constant 0 : index
      %c0_20 = arith.constant 0 : index
      %36 = vector.load %arg6[%c0_19, %c0_20] : memref<8x128xf32, #tpu.memory_space<vmem>>, vector<8x128xf32>
      %37 = arith.addf %36, %32 : vector<8x128xf32>
      %c0_21 = arith.constant 0 : index
      %c0_22 = arith.constant 0 : index
      %38 = vector.load %arg6[%c0_21, %c0_22] : memref<8x128xf32, #tpu.memory_space<vmem>>, vector<8x128xf32>
      tpu.vector_store %arg6[%c0_21, %c0_22], %37 {strides = array<i32>} : memref<8x128xf32, #tpu.memory_space<vmem>>, vector<8x128xf32>,
    } else {
    }
    %c16_i32_4 = arith.constant 16 : i32
    %10 = arith.addi %5, %c16_i32_4 : i32
    %c16_i32_5 = arith.constant 16 : i32
    %11 = arith.cmpi sgt, %10, %c16_i32_5 : i32
    %12 = arith.extui %11 : i1 to i32
    %c0_i32_6 = arith.constant 0 : i32
    %13 = arith.cmpi ne, %12, %c0_i32_6 : i32
    scf.if %13 {
      %cst = arith.constant 0.000000e+00 : f32
      %17 = vector.broadcast %cst : f32 to vector<8x128xf32>
      %c0_i32_9 = arith.constant 0 : i32
      %c16_i32_10 = arith.constant 16 : i32
      %18 = arith.muli %c0_i32_9, %c16_i32_10 : i32
      %19 = tpu.assume_multiple %18, 16 : i32
      %20 = arith.index_cast %19 : i32 to index
      %c0 = arith.constant 0 : index
      %21 = vector.load %arg2[%20, %c0] : memref<16x128xf32, #tpu.memory_space<vmem>>, vector<16x128xf32>
      %22 = arith.index_cast %19 : i32 to index
      %c0_11 = arith.constant 0 : index
      %23 = vector.load %arg3[%22, %c0_11] : memref<16x128xf32, #tpu.memory_space<vmem>>, vector<16x128xf32>
      %24 = arith.subf %21, %23 : vector<16x128xf32>
      %25 = arith.addi %5, %19 : i32
      %26 = tpu.iota {dimensions = array<i32: 0>} : vector<16x128xi32>
      %27 = vector.broadcast %25 : i32 to vector<16x128xi32>
      %28 = arith.addi %27, %26 : vector<16x128xi32>
      %c16_i32_12 = arith.constant 16 : i32
      %29 = vector.broadcast %c16_i32_12 : i32 to vector<16x128xi32>
      %30 = arith.cmpi slt, %28, %29 : vector<16x128xi32>
      %cst_13 = arith.constant 0.000000e+00 : f32
      %31 = vector.broadcast %cst_13 : f32 to vector<16x128xf32>
      %32 = arith.select %30, %24, %31 : vector<16x128xi1>, vector<16x128xf32>
      %33 = arith.mulf %32, %32 : vector<16x128xf32>
      %34 = vector.shape_cast %33 : vector<16x128xf32> to vector<2x8x128xf32>
      %cst_14 = arith.constant dense<0.000000e+00> : vector<8x128xf32>
      %35 = vector.multi_reduction <add>, %34, %cst_14 [0] : vector<2x8x128xf32> to vector<8x128xf32>
      %36 = arith.addf %17, %35 : vector<8x128xf32>
      %37 = math.absf %32 : vector<16x128xf32>
      %38 = vector.shape_cast %37 : vector<16x128xf32> to vector<2x8x128xf32>
      %cst_15 = arith.constant dense<0.000000e+00> : vector<8x128xf32>
      %39 = vector.multi_reduction <add>, %38, %cst_15 [0] : vector<2x8x128xf32> to vector<8x128xf32>
      %40 = arith.addf %17, %39 : vector<8x128xf32>
      %c1_i32_16 = arith.constant 1 : i32
      %c0_17 = arith.constant 0 : index
      %c0_18 = arith.constant 0 : index
      %41 = vector.load %arg5[%c0_17, %c0_18] : memref<8x128xf32, #tpu.memory_space<vmem>>, vector<8x128xf32>
      %42 = arith.addf %41, %36 : vector<8x128xf32>
      %c0_19 = arith.constant 0 : index
      %c0_20 = arith.constant 0 : index
      %43 = vector.load %arg5[%c0_19, %c0_20] : memref<8x128xf32, #tpu.memory_space<vmem>>, vector<8x128xf32>
      tpu.vector_store %arg5[%c0_19, %c0_20], %42 {strides = array<i32>} : memref<8x128xf32, #tpu.memory_space<vmem>>, vector<8x128xf32>,
      %c0_21 = arith.constant 0 : index
      %c0_22 = arith.constant 0 : index
      %44 = vector.load %arg6[%c0_21, %c0_22] : memref<8x128xf32, #tpu.memory_space<vmem>>, vector<8x128xf32>
      %45 = arith.addf %44, %40 : vector<8x128xf32>
      %c0_23 = arith.constant 0 : index
      %c0_24 = arith.constant 0 : index
      %46 = vector.load %arg6[%c0_23, %c0_24] : memref<8x128xf32, #tpu.memory_space<vmem>>, vector<8x128xf32>
      tpu.vector_store %arg6[%c0_23, %c0_24], %45 {strides = array<i32>} : memref<8x128xf32, #tpu.memory_space<vmem>>, vector<8x128xf32>,
    } else {
    }
    %c0_i32_7 = arith.constant 0 : i32
    %14 = arith.cmpi eq, %arg1, %c0_i32_7 : i32
    %15 = arith.extui %14 : i1 to i32
    %c0_i32_8 = arith.constant 0 : i32
    %16 = arith.cmpi ne, %15, %c0_i32_8 : i32
    scf.if %16 {
      %c0 = arith.constant 0 : index
      %c0_9 = arith.constant 0 : index
      %17 = vector.load %arg5[%c0, %c0_9] : memref<8x128xf32, #tpu.memory_space<vmem>>, vector<8x128xf32>
      %cst = arith.constant 0.699999988 : f32
      %18 = vector.broadcast %cst : f32 to vector<8x128xf32>
      %19 = arith.mulf %18, %17 : vector<8x128xf32>
      %c0_10 = arith.constant 0 : index
      %c0_11 = arith.constant 0 : index
      %20 = vector.load %arg6[%c0_10, %c0_11] : memref<8x128xf32, #tpu.memory_space<vmem>>, vector<8x128xf32>
      %cst_12 = arith.constant 3.000000e-01 : f32
      %21 = vector.broadcast %cst_12 : f32 to vector<8x128xf32>
      %22 = arith.mulf %21, %20 : vector<8x128xf32>
      %23 = arith.addf %19, %22 : vector<8x128xf32>
      %c0_13 = arith.constant 0 : index
      %c0_14 = arith.constant 0 : index
      %c0_15 = arith.constant 0 : index
      %24 = vector.load %arg4[%c0_13, %c0_14, %c0_15] : memref<1x8x128xf32, #tpu.memory_space<vmem>>, vector<1x8x128xf32>
      %25 = vector.shape_cast %24 : vector<1x8x128xf32> to vector<8x128xf32>
      %26 = vector.shape_cast %23 : vector<8x128xf32> to vector<1x8x128xf32>
      tpu.vector_store %arg4[%c0_13, %c0_14, %c0_15], %26 {strides = array<i32>} : memref<1x8x128xf32, #tpu.memory_space<vmem>>, vector<1x8x128xf32>,
    } else {
    }
    return
  }
  func.func @transform_0(%arg0: i32, %arg1: i32) -> (i32, i32) {
    %c1_i32 = arith.constant 1 : i32
    %0 = arith.muli %arg0, %c1_i32 : i32
    %1 = arith.addi %0, %arg1 : i32
    %c0_i32 = arith.constant 0 : i32
    %2 = arith.minsi %1, %c0_i32 : i32
    %c0_i32_0 = arith.constant 0 : i32
    %c0_i32_1 = arith.constant 0 : i32
    return %2, %c0_i32_0 : i32, i32
  }
  func.func @transform_1(%arg0: i32, %arg1: i32) -> (i32, i32) {
    %c1_i32 = arith.constant 1 : i32
    %0 = arith.muli %arg0, %c1_i32 : i32
    %1 = arith.addi %0, %arg1 : i32
    %c0_i32 = arith.constant 0 : i32
    %2 = arith.minsi %1, %c0_i32 : i32
    %c0_i32_0 = arith.constant 0 : i32
    %c0_i32_1 = arith.constant 0 : i32
    return %2, %c0_i32_0 : i32, i32
  }
  func.func @transform_2(%arg0: i32, %arg1: i32) -> (i32, i32, i32) {
    %c0_i32 = arith.constant 0 : i32
    %c0_i32_0 = arith.constant 0 : i32
    %c0_i32_1 = arith.constant 0 : i32
    return %arg0, %c0_i32, %c0_i32_0 : i32, i32, i32
  }
}

</mosaic_0001>

<bundles_post_ra>
// kernel: tpu_custom_call.1
= control target key start
LH: loop header
LB: loop body
LE: loop exit
PB: predicated region body
PF: predicated region fallthrough
CT: control target
= control target key end

     0   :  { %7 = vsyncpa [#allocation5], 0  ;;  %s290_s0 = inlined_call_operand.hbm [shape: f32[16,128], index: 0, kind: input, shape index: {}]   ;;  %s291_s1 = inlined_call_operand.hbm [shape: f32[16,128], index: 1, kind: input, shape index: {}]   ;;  %s292_s2 = inlined_call_operand.hbm [shape: f32[1,8,128], index: 2, kind: output, shape index: {}]  }
   0x1   :  { %8 = vsyncpa [#allocation8], 0 }
   0x2   :  { %9 = vsyncpa [#allocation6], 0  ;;  %s234_s9 = smov [#allocation4]   ;;  %s162_s13 = scalar_lea.hbm %s290_s0, 256 }
   0x3   :  { %s21_s10 = sshll.u32 %s234_s9, 4  ;;  %p163_p0 = scmp.ne.s32.totalorder %s290_s0, %s162_s13  ;;  %s22_s10 = int_to_ptr.vmem [resolvable:$true] %s21_s10 }
   0x4   :  { %p166_p1 = scmp.lt.u32.totalorder %s162_s13, %s290_s0 }
   0x6   :  { %p168_p2 = pnand %p166_p1, %p163_p0 }
   0x8   :  { %171 = shalt.err (!%p168_p2)
}
   0x9   :  { %s172_s18 = scalar_lea.vmem %s22_s10, 256  ;;  %p177_p4 = scmp.lt.s32.totalorder %s22_s10, %s22_s10 }
   0xa   :  { %p173_p3 = scmp.ne.s32.totalorder %s22_s10, %s172_s18  ;;  %p178_p5 = scmp.lt.s32.totalorder %s172_s18, %s172_s18 }
   0xc   :  { %p179_p6 = por %p178_p5, %p177_p4 }
   0xe   :  { %p180_p7 = pnand %p179_p6, %p173_p3 }
  0x10   :  { %183 = shalt.err (!%p180_p7)
}
  0x11   :  { %s235_s19 = smov 128   ;;  %s236_s20 = smov 8  }
  0x12   :  { %27 = dma.hbm_to_vmem [thread:$0]  %s290_s0, 256, %s22_s10, [#allocation5], %s235_s19, %s235_s19, %s236_s20  }
  0x13   :  { %s237_s23 = smov [#allocation7]   ;;  %s184_s27 = scalar_lea.hbm %s291_s1, 256 }
  0x14   :  { %s39_s24 = sshll.u32 %s237_s23, 4  ;;  %p185_p8 = scmp.ne.s32.totalorder %s291_s1, %s184_s27  ;;  %s40_s24 = int_to_ptr.vmem [resolvable:$true] %s39_s24 }
  0x15   :  { %p188_p9 = scmp.lt.u32.totalorder %s184_s27, %s291_s1 }
  0x17   :  { %p190_p10 = pnand %p188_p9, %p185_p8 }
  0x19   :  { %193 = shalt.err (!%p190_p10)
}
  0x1a   :  { %s194_s4 = scalar_lea.vmem %s40_s24, 256  ;;  %p199_p12 = scmp.lt.s32.totalorder %s40_s24, %s40_s24 }
  0x1b   :  { %p195_p11 = scmp.ne.s32.totalorder %s40_s24, %s194_s4  ;;  %p200_p13 = scmp.lt.s32.totalorder %s194_s4, %s194_s4 }
  0x1d   :  { %p201_p0 = por %p200_p13, %p199_p12 }
  0x1f   :  { %p202_p1 = pnand %p201_p0, %p195_p11 }
  0x21   :  { %205 = shalt.err (!%p202_p1)
}
  0x22   :  { %45 = dma.hbm_to_vmem [thread:$0]  %s291_s1, 256, %s40_s24, [#allocation8], %s235_s19, %s235_s19, %s236_s20  }
  0x23   :  { %228 = dma.done.wait [#allocation5], 256  }
  0x24   :  { %229 = vsyncadd [#allocation5], 4294967040 }
  0x25   :  { %230 = dma.done.wait [#allocation8], 256  }
  0x26   :  { %231 = vsyncadd [#allocation8], 4294967040  ;;  %v73_v0 = vld [vmem:[#allocation4] sm:$0xff]  ;;  %v74_v1 = vld [vmem:[#allocation4 + $0x8] sm:$0xff]  ;;  %s238_s6 = smov [#allocation9]  }
  0x27   :  { %v75_v2 = vld [vmem:[#allocation7] sm:$0xff]  ;;  %v76_v3 = vld [vmem:[#allocation7 + $0x8] sm:$0xff]  ;;  %s143_s7 = sshll.u32 %s238_s6, 4  ;;  %s144_s7 = int_to_ptr.vmem [resolvable:$true] %s143_s7 }
  0x28   :  { %v77_v4 = vsub.f32 %v73_v0, %v75_v2  ;;  %v78_v5 = vsub.f32 %v74_v1, %v76_v3  ;;  %s206_s1 = scalar_lea.vmem %s144_s7, 128  ;;  %p211_p3 = scmp.lt.s32.totalorder %s144_s7, %s144_s7 }
  0x29   :  { %p207_p2 = scmp.ne.s32.totalorder %s144_s7, %s206_s1  ;;  %p212_p4 = scmp.lt.s32.totalorder %s206_s1, %s206_s1 }
  0x2a   :  { %v79_v6 = vmul.f32 %v77_v4, %v77_v4  ;;  %v83_v7 = vand.u32 2147483647, %v77_v4  ;;  %v80_v8 = vmul.f32 %v78_v5, %v78_v5  ;;  %v84_v9 = vand.u32 2147483647, %v78_v5 }
  0x2b   :  { %p213_p5 = por %p212_p4, %p211_p3 }
  0x2c   :  { %v81_v10 = vadd.f32 %v80_v8, %v79_v6  ;;  %v85_v11 = vadd.f32 %v84_v9, %v83_v7 }
  0x2d   :  { %p214_p6 = pnand %p213_p5, %p207_p2 }
  0x2e   :  { %v132_v12 = vmul.f32 0.7, %v81_v10  ;;  %v134_v13 = vmul.f32 0.3, %v85_v11 }
  0x30   :  { %v135_v14 = vadd.f32 %v134_v13, %v132_v12 }
  0x32   :  { %136 = vst [vmem:[#allocation9] sm:$0xff] %v135_v14 }
  0x33   :  { %217 = shalt.err (!%p214_p6)
}
  0x34   :  { %s218_s10 = scalar_lea.hbm %s292_s2, 128 }
  0x35   :  { %p219_p7 = scmp.ne.s32.totalorder %s292_s2, %s218_s10  ;;  %p222_p8 = scmp.lt.u32.totalorder %s218_s10, %s292_s2 }
  0x37   :  { %p224_p9 = pnand %p222_p8, %p219_p7 }
  0x39   :  { %227 = shalt.err (!%p224_p9)
}
  0x3a   :  { %146 = dma.vmem_to_hbm [thread:$0]  %s144_s7, 128, %s292_s2, [#allocation6]  }
  0x3b   :  { %232 = dma.done.wait [#allocation6], 128  }
  0x3c   :  { %233 = vsyncadd [#allocation6], 4294967168 }
  0x3d   :  { %150 = vsyncpa [#allocation5], 1 }
  0x3e   :  { %151 = vsyncpa [#allocation8], 1 }
  0x3f   :  { %152 = vsyncpa [#allocation6], 1 }

</bundles_post_ra>
